<compile_context>
chip_gen: v7x
topology: tpu7x:2x2x1
jax: 0.10.0
libtpu: 0.0.40
codegen_flags: <defaults>
</compile_context>

<pallas_src>
import jax
import jax.numpy as jnp
from jax.experimental import pallas as pl
from jax.experimental.pallas import tpu as pltpu


def _mlp_kernel(x_ref,
                wf_ref, bf_ref,          # fused [linear1.0 | skip]
                w1b_ref, b1b_ref,        # linear1.2
                w2a_ref, b2a_ref,        # linear2.0
                w2b_ref, b2b_ref,        # linear2.2
                o_ref):
    d_out = o_ref.shape[-1]
    x = x_ref[...]                                            # (TM, d_in) bf16

    # Fused first layer + skip: one MXU pass over x, N = 2*d_out lanes.
    hs = jnp.dot(x, wf_ref[...], preferred_element_type=jnp.float32)
    hs = hs + bf_ref[...]                                     # bias add in f32
    h = jnp.maximum(hs[:, :d_out], 0.0)                       # ReLU branch
    s = hs[:, d_out:]                                         # skip branch

    # linear1 second layer
    h = jnp.dot(h.astype(jnp.bfloat16), w1b_ref[...],
                preferred_element_type=jnp.float32) + b1b_ref[...]

    # act(linear1(x) + skip(x))
    z = jnp.maximum(h + s, 0.0)

    # linear2: Linear -> ReLU -> Linear
    z = jnp.dot(z.astype(jnp.bfloat16), w2a_ref[...],
                preferred_element_type=jnp.float32) + b2a_ref[...]
    z = jnp.maximum(z, 0.0)
    z = jnp.dot(z.astype(jnp.bfloat16), w2b_ref[...],
                preferred_element_type=jnp.float32) + b2b_ref[...]

    o_ref[...] = z.astype(o_ref.dtype)


def _round_up(a, b):
    return ((a + b - 1) // b) * b


def mlp_forward(x, params, *, tm_target=2048):
    """x: (..., input_len) float32. params: dict from make_params()[0]."""
    orig_shape = x.shape
    d_in = orig_shape[-1]
    x2d = x.reshape(-1, d_in).astype(jnp.bfloat16)            # bf16 activations
    m = x2d.shape[0]
    d_out = params["w2b"].shape[1]
    two_d_out = params["wf"].shape[1]

    # Row tile: multiple of 8 (sublane), capped at tm_target; pad M to a
    # multiple of the tile so the grid divides evenly (padded rows are sliced
    # off the output).
    tm = min(_round_up(max(tm_target, 8), 8), _round_up(m, 8))
    m_pad = _round_up(m, tm)
    if m_pad != m:
        x2d = jnp.pad(x2d, ((0, m_pad - m), (0, 0)))
    grid = (m_pad // tm,)

    # Advisory cost hint for the XLA scheduler.
    flops = 2 * m_pad * (d_in * two_d_out + 3 * d_out * d_out)
    bytes_accessed = (m_pad * d_in * 2                        # x (bf16)
                      + m_pad * d_out * 4                     # out (f32)
                      + (d_in * two_d_out + 3 * d_out * d_out) * 2  # weights
                      + (two_d_out + 3 * d_out) * 4)          # biases

    const2d = lambda i: (0, 0)     # weights / biases: resident across the grid
    row_map = lambda i: (i, 0)

    out = pl.pallas_call(
        _mlp_kernel,
        out_shape=jax.ShapeDtypeStruct((m_pad, d_out), jnp.float32),
        grid=grid,
        in_specs=[
            pl.BlockSpec((tm, d_in), row_map),                # x
            pl.BlockSpec((d_in, two_d_out), const2d),         # wf
            pl.BlockSpec((1, two_d_out), const2d),            # bf
            pl.BlockSpec((d_out, d_out), const2d),            # w1b
            pl.BlockSpec((1, d_out), const2d),                # b1b
            pl.BlockSpec((d_out, d_out), const2d),            # w2a
            pl.BlockSpec((1, d_out), const2d),                # b2a
            pl.BlockSpec((d_out, d_out), const2d),            # w2b
            pl.BlockSpec((1, d_out), const2d),                # b2b
        ],
        out_specs=pl.BlockSpec((tm, d_out), row_map),
        compiler_params=pltpu.CompilerParams(
            dimension_semantics=("parallel",),                # shard M over TCs
            vmem_limit_bytes=32 * 1024 * 1024,
        ),
        cost_estimate=pl.CostEstimate(
            flops=flops, transcendentals=0, bytes_accessed=bytes_accessed),
    )(x2d,
      params["wf"], params["bf"],
      params["w1b"], params["b1b"],
      params["w2a"], params["b2a"],
      params["w2b"], params["b2b"])

    out = out[:m]
    return out.reshape(orig_shape[:-1] + (d_out,))


def weight_norm_effective(v, g):
    """PyTorch weight_norm (dim=0): row-wise normalization of v (out, in)."""
    norm = jnp.sqrt(jnp.sum(v * v, axis=1, keepdims=True))
    return (g[:, None] / norm) * v


def make_params(key, input_len, output_len):
    """Returns (kernel_params_bf16_fused, reference_params_f32)."""
    keys = jax.random.split(key, 15)
    ref = {}

    def make_linear(kv, kg, kb, fan_in, fan_out, name):
        v = jax.random.normal(kv, (fan_out, fan_in), jnp.float32) * 0.2
        g = 1.0 + 0.1 * jax.random.normal(kg, (fan_out,), jnp.float32)
        b = 0.1 * jax.random.normal(kb, (fan_out,), jnp.float32)
        w_eff = weight_norm_effective(v, g)                   # (out, in)
        ref["w" + name] = jnp.transpose(w_eff)                # (in, out)
        ref["b" + name] = b.reshape(1, fan_out)

    make_linear(keys[0], keys[1], keys[2], input_len, output_len, "1a")
    make_linear(keys[3], keys[4], keys[5], output_len, output_len, "1b")
    make_linear(keys[6], keys[7], keys[8], input_len, output_len, "s")
    make_linear(keys[9], keys[10], keys[11], output_len, output_len, "2a")
    make_linear(keys[12], keys[13], keys[14], output_len, output_len, "2b")

    kparams = {
        # Fused first layer + skip: columns [w1a | ws], biases [b1a | bs].
        "wf": jnp.concatenate([ref["w1a"], ref["ws"]], axis=1).astype(jnp.bfloat16),
        "bf": jnp.concatenate([ref["b1a"], ref["bs"]], axis=1),           # f32
        "w1b": ref["w1b"].astype(jnp.bfloat16), "b1b": ref["b1b"],
        "w2a": ref["w2a"].astype(jnp.bfloat16), "b2a": ref["b2a"],
        "w2b": ref["w2b"].astype(jnp.bfloat16), "b2b": ref["b2b"],
    }
    return kparams, ref


def mlp_reference(x2d, ref):
    """Pure-JAX f32 reference of the forward pass."""
    def lin(h, w, b):
        return h @ w + b
    h = jnp.maximum(lin(x2d, ref["w1a"], ref["b1a"]), 0.0)
    h = lin(h, ref["w1b"], ref["b1b"])
    s = lin(x2d, ref["ws"], ref["bs"])
    z = jnp.maximum(h + s, 0.0)
    z = jnp.maximum(lin(z, ref["w2a"], ref["b2a"]), 0.0)
    z = lin(z, ref["w2b"], ref["b2b"])
    return z


if __name__ == "__main__":
    key = jax.random.PRNGKey(0)
    k_x, k_p = jax.random.split(key)

    batch, seq, input_len, output_len = 2, 8, 16, 32
    x = jax.random.normal(k_x, (batch, seq, input_len), jnp.float32)
    kparams, ref_params = make_params(k_p, input_len, output_len)

    ref = mlp_reference(x.reshape(-1, input_len), ref_params)
    ref = ref.reshape(batch, seq, output_len)

    # Default (production) tiling: M fits in one tile here.
    out = mlp_forward(x, kparams)
    out = jax.block_until_ready(out)
    assert out.shape == (batch, seq, output_len)
    # bf16 storage + f32 accumulation -> loose tolerance vs. the f32 reference.
    assert jnp.allclose(out, ref, atol=5e-2, rtol=5e-2), (
        "max abs err %r" % float(jnp.max(jnp.abs(out - ref))))

    # Tiny tile to exercise a multi-step grid (pipelined path) at small shapes.
    out_g = mlp_forward(x, kparams, tm_target=8)
    out_g = jax.block_until_ready(out_g)
    assert jnp.allclose(out_g, ref, atol=5e-2, rtol=5e-2), (
        "max abs err %r" % float(jnp.max(jnp.abs(out_g - ref))))

    print("KERNEL_OK")
</pallas_src>

<mosaic_0001>
module attributes {stable_mosaic.version = 11 : i64} {
  func.func @_mlp_kernel(%arg0: i32, %arg1: memref<16x16xbf16, #tpu.memory_space<vmem>>, %arg2: memref<16x64xbf16, #tpu.memory_space<vmem>>, %arg3: memref<1x64xf32, #tpu.memory_space<vmem>>, %arg4: memref<32x32xbf16, #tpu.memory_space<vmem>>, %arg5: memref<1x32xf32, #tpu.memory_space<vmem>>, %arg6: memref<32x32xbf16, #tpu.memory_space<vmem>>, %arg7: memref<1x32xf32, #tpu.memory_space<vmem>>, %arg8: memref<32x32xbf16, #tpu.memory_space<vmem>>, %arg9: memref<1x32xf32, #tpu.memory_space<vmem>>, %arg10: memref<16x32xf32, #tpu.memory_space<vmem>>) attributes {dimension_semantics = [#tpu.dimension_semantics<parallel>], iteration_bounds = array<i64: 1>, scalar_prefetch = 0 : i64, scratch_operands = 0 : i64, tpu.core_type = #tpu.core_type<tc>, window_params = [{transform_indices = @transform_0, window_bounds = array<i64: 16, 16>}, {pipeline_mode = #tpu.pipeline_mode<synchronous>, transform_indices = @transform_1, window_bounds = array<i64: 16, 64>}, {pipeline_mode = #tpu.pipeline_mode<synchronous>, transform_indices = @transform_2, window_bounds = array<i64: 1, 64>}, {pipeline_mode = #tpu.pipeline_mode<synchronous>, transform_indices = @transform_3, window_bounds = array<i64: 32, 32>}, {pipeline_mode = #tpu.pipeline_mode<synchronous>, transform_indices = @transform_4, window_bounds = array<i64: 1, 32>}, {pipeline_mode = #tpu.pipeline_mode<synchronous>, transform_indices = @transform_5, window_bounds = array<i64: 32, 32>}, {pipeline_mode = #tpu.pipeline_mode<synchronous>, transform_indices = @transform_6, window_bounds = array<i64: 1, 32>}, {pipeline_mode = #tpu.pipeline_mode<synchronous>, transform_indices = @transform_7, window_bounds = array<i64: 32, 32>}, {pipeline_mode = #tpu.pipeline_mode<synchronous>, transform_indices = @transform_8, window_bounds = array<i64: 1, 32>}, {transform_indices = @transform_9, window_bounds = array<i64: 16, 32>}]} {
    %c0 = arith.constant 0 : index
    %c0_0 = arith.constant 0 : index
    %0 = vector.load %arg1[%c0, %c0_0] : memref<16x16xbf16, #tpu.memory_space<vmem>>, vector<16x16xbf16>
    %c0_1 = arith.constant 0 : index
    %c0_2 = arith.constant 0 : index
    %1 = vector.load %arg2[%c0_1, %c0_2] : memref<16x64xbf16, #tpu.memory_space<vmem>>, vector<16x64xbf16>
    %cst = arith.constant dense<0.000000e+00> : vector<16x64xf32>
    %2 = tpu.matmul %0, %1, %cst {dimension_numbers = #tpu.dot_dimension_numbers<[1], [0], [0], [1], [0, 0, 1, 1], [], []>} : vector<16x16xbf16>, vector<16x64xbf16>, vector<16x64xf32> -> vector<16x64xf32>
    %c0_3 = arith.constant 0 : index
    %c0_4 = arith.constant 0 : index
    %3 = vector.load %arg3[%c0_3, %c0_4] : memref<1x64xf32, #tpu.memory_space<vmem>>, vector<1x64xf32>
    %4 = vector.broadcast %3 : vector<1x64xf32> to vector<16x64xf32>
    %5 = arith.addf %2, %4 : vector<16x64xf32>
    %6 = vector.extract_strided_slice %5 {offsets = [0, 0], sizes = [16, 32], strides = [1, 1]} : vector<16x64xf32> to vector<16x32xf32>
    %cst_5 = arith.constant 0.000000e+00 : f32
    %7 = vector.broadcast %cst_5 : f32 to vector<16x32xf32>
    %8 = arith.maximumf %6, %7 : vector<16x32xf32>
    %9 = vector.extract_strided_slice %5 {offsets = [0, 32], sizes = [16, 32], strides = [1, 1]} : vector<16x64xf32> to vector<16x32xf32>
    %10 = arith.truncf %8 : vector<16x32xf32> to vector<16x32xbf16>
    %c0_6 = arith.constant 0 : index
    %c0_7 = arith.constant 0 : index
    %11 = vector.load %arg4[%c0_6, %c0_7] : memref<32x32xbf16, #tpu.memory_space<vmem>>, vector<32x32xbf16>
    %cst_8 = arith.constant dense<0.000000e+00> : vector<16x32xf32>
    %12 = tpu.matmul %10, %11, %cst_8 {dimension_numbers = #tpu.dot_dimension_numbers<[1], [0], [0], [1], [0, 0, 1, 1], [], []>} : vector<16x32xbf16>, vector<32x32xbf16>, vector<16x32xf32> -> vector<16x32xf32>
    %c0_9 = arith.constant 0 : index
    %c0_10 = arith.constant 0 : index
    %13 = vector.load %arg5[%c0_9, %c0_10] : memref<1x32xf32, #tpu.memory_space<vmem>>, vector<1x32xf32>
    %14 = vector.broadcast %13 : vector<1x32xf32> to vector<16x32xf32>
    %15 = arith.addf %12, %14 : vector<16x32xf32>
    %16 = arith.addf %15, %9 : vector<16x32xf32>
    %cst_11 = arith.constant 0.000000e+00 : f32
    %17 = vector.broadcast %cst_11 : f32 to vector<16x32xf32>
    %18 = arith.maximumf %16, %17 : vector<16x32xf32>
    %19 = arith.truncf %18 : vector<16x32xf32> to vector<16x32xbf16>
    %c0_12 = arith.constant 0 : index
    %c0_13 = arith.constant 0 : index
    %20 = vector.load %arg6[%c0_12, %c0_13] : memref<32x32xbf16, #tpu.memory_space<vmem>>, vector<32x32xbf16>
    %cst_14 = arith.constant dense<0.000000e+00> : vector<16x32xf32>
    %21 = tpu.matmul %19, %20, %cst_14 {dimension_numbers = #tpu.dot_dimension_numbers<[1], [0], [0], [1], [0, 0, 1, 1], [], []>} : vector<16x32xbf16>, vector<32x32xbf16>, vector<16x32xf32> -> vector<16x32xf32>
    %c0_15 = arith.constant 0 : index
    %c0_16 = arith.constant 0 : index
    %22 = vector.load %arg7[%c0_15, %c0_16] : memref<1x32xf32, #tpu.memory_space<vmem>>, vector<1x32xf32>
    %23 = vector.broadcast %22 : vector<1x32xf32> to vector<16x32xf32>
    %24 = arith.addf %21, %23 : vector<16x32xf32>
    %cst_17 = arith.constant 0.000000e+00 : f32
    %25 = vector.broadcast %cst_17 : f32 to vector<16x32xf32>
    %26 = arith.maximumf %24, %25 : vector<16x32xf32>
    %27 = arith.truncf %26 : vector<16x32xf32> to vector<16x32xbf16>
    %c0_18 = arith.constant 0 : index
    %c0_19 = arith.constant 0 : index
    %28 = vector.load %arg8[%c0_18, %c0_19] : memref<32x32xbf16, #tpu.memory_space<vmem>>, vector<32x32xbf16>
    %cst_20 = arith.constant dense<0.000000e+00> : vector<16x32xf32>
    %29 = tpu.matmul %27, %28, %cst_20 {dimension_numbers = #tpu.dot_dimension_numbers<[1], [0], [0], [1], [0, 0, 1, 1], [], []>} : vector<16x32xbf16>, vector<32x32xbf16>, vector<16x32xf32> -> vector<16x32xf32>
    %c0_21 = arith.constant 0 : index
    %c0_22 = arith.constant 0 : index
    %30 = vector.load %arg9[%c0_21, %c0_22] : memref<1x32xf32, #tpu.memory_space<vmem>>, vector<1x32xf32>
    %31 = vector.broadcast %30 : vector<1x32xf32> to vector<16x32xf32>
    %32 = arith.addf %29, %31 : vector<16x32xf32>
    %c0_23 = arith.constant 0 : index
    %c0_24 = arith.constant 0 : index
    %33 = vector.load %arg10[%c0_23, %c0_24] : memref<16x32xf32, #tpu.memory_space<vmem>>, vector<16x32xf32>
    tpu.vector_store %arg10[%c0_23, %c0_24], %32 {strides = array<i32>} : memref<16x32xf32, #tpu.memory_space<vmem>>, vector<16x32xf32>,
    return
  }
  func.func @transform_0(%arg0: i32) -> (i32, i32) {
    %c0_i32 = arith.constant 0 : i32
    %c0_i32_0 = arith.constant 0 : i32
    return %arg0, %c0_i32 : i32, i32
  }
  func.func @transform_1(%arg0: i32) -> (i32, i32) {
    %c0_i32 = arith.constant 0 : i32
    %c0_i32_0 = arith.constant 0 : i32
    %c0_i32_1 = arith.constant 0 : i32
    return %c0_i32, %c0_i32_0 : i32, i32
  }
  func.func @transform_2(%arg0: i32) -> (i32, i32) {
    %c0_i32 = arith.constant 0 : i32
    %c0_i32_0 = arith.constant 0 : i32
    %c0_i32_1 = arith.constant 0 : i32
    return %c0_i32, %c0_i32_0 : i32, i32
  }
  func.func @transform_3(%arg0: i32) -> (i32, i32) {
    %c0_i32 = arith.constant 0 : i32
    %c0_i32_0 = arith.constant 0 : i32
    %c0_i32_1 = arith.constant 0 : i32
    return %c0_i32, %c0_i32_0 : i32, i32
  }
  func.func @transform_4(%arg0: i32) -> (i32, i32) {
    %c0_i32 = arith.constant 0 : i32
    %c0_i32_0 = arith.constant 0 : i32
    %c0_i32_1 = arith.constant 0 : i32
    return %c0_i32, %c0_i32_0 : i32, i32
  }
  func.func @transform_5(%arg0: i32) -> (i32, i32) {
    %c0_i32 = arith.constant 0 : i32
    %c0_i32_0 = arith.constant 0 : i32
    %c0_i32_1 = arith.constant 0 : i32
    return %c0_i32, %c0_i32_0 : i32, i32
  }
  func.func @transform_6(%arg0: i32) -> (i32, i32) {
    %c0_i32 = arith.constant 0 : i32
    %c0_i32_0 = arith.constant 0 : i32
    %c0_i32_1 = arith.constant 0 : i32
    return %c0_i32, %c0_i32_0 : i32, i32
  }
  func.func @transform_7(%arg0: i32) -> (i32, i32) {
    %c0_i32 = arith.constant 0 : i32
    %c0_i32_0 = arith.constant 0 : i32
    %c0_i32_1 = arith.constant 0 : i32
    return %c0_i32, %c0_i32_0 : i32, i32
  }
  func.func @transform_8(%arg0: i32) -> (i32, i32) {
    %c0_i32 = arith.constant 0 : i32
    %c0_i32_0 = arith.constant 0 : i32
    %c0_i32_1 = arith.constant 0 : i32
    return %c0_i32, %c0_i32_0 : i32, i32
  }
  func.func @transform_9(%arg0: i32) -> (i32, i32) {
    %c0_i32 = arith.constant 0 : i32
    %c0_i32_0 = arith.constant 0 : i32
    return %arg0, %c0_i32 : i32, i32
  }
}

</mosaic_0001>

<bundles_post_ra>
// kernel: tpu_custom_call.1
= control target key start
LH: loop header
LB: loop body
LE: loop exit
PB: predicated region body
PF: predicated region fallthrough
CT: control target
= control target key end

     0   :  { %14 = vsyncpa [#allocation3], 0  ;;  %s768_s0 = inlined_call_operand.hbm [shape: bf16[16,16], index: 0, kind: input, shape index: {}]   ;;  %s769_s1 = inlined_call_operand.hbm [shape: bf16[16,64], index: 1, kind: input, shape index: {}]   ;;  %s770_s2 = inlined_call_operand.vmem [shape: f32[1,64], index: 2, kind: input, shape index: {}]   ;;  %s771_s3 = inlined_call_operand.hbm [shape: bf16[32,32], index: 3, kind: input, shape index: {}]   ;;  %s772_s4 = inlined_call_operand.vmem [shape: f32[1,32], index: 4, kind: input, shape index: {}]   ;;  %s773_s5 = inlined_call_operand.vmem [shape: bf16[32,32], index: 5, kind: input, shape index: {}]   ;;  %s774_s6 = inlined_call_operand.vmem [shape: f32[1,32], index: 6, kind: input, shape index: {}]   ;;  %s775_s7 = inlined_call_operand.hbm [shape: bf16[32,32], index: 7, kind: input, shape index: {}]   ;;  %s776_s8 = inlined_call_operand.vmem [shape: f32[1,32], index: 8, kind: input, shape index: {}]   ;;  %s777_s9 = inlined_call_operand.hbm [shape: f32[16,32], index: 9, kind: output, shape index: {}]  }
   0x1   :  { %15 = vsyncpa [#allocation6], 0 }
   0x2   :  { %16 = vsyncpa [#allocation9], 0 }
   0x3   :  { %17 = vsyncpa [#allocation4], 0  ;;  %s593_s30 = smov [#allocation5]   ;;  %s594_s11 = smov [#allocation2]  }
   0x4   :  { %s35_s10 = sshll.u32 %s593_s30, 4  ;;  %s23_s12 = sshll.u32 %s594_s11, 4  ;;  %s36_s10 = int_to_ptr.vmem [resolvable:$true] %s35_s10  ;;  %s655_s12 = int_to_ptr.vmem [resolvable:$true] %s23_s12 }
   0x5   :  { %s475_s15 = scalar_lea.hbm %s769_s1, 128 }
   0x6   :  { %p476_p0 = scmp.ne.s32.totalorder %s769_s1, %s475_s15  ;;  %p479_p1 = scmp.lt.u32.totalorder %s475_s15, %s769_s1 }
   0x8   :  { %p481_p2 = pnand %p479_p1, %p476_p0 }
   0xa   :  { %484 = shalt.err (!%p481_p2)
}
   0xb   :  { %s485_s20 = scalar_lea.vmem %s36_s10, 128  ;;  %p490_p4 = scmp.lt.s32.totalorder %s36_s10, %s36_s10 }
   0xc   :  { %p486_p3 = scmp.ne.s32.totalorder %s36_s10, %s485_s20  ;;  %p491_p5 = scmp.lt.s32.totalorder %s485_s20, %s485_s20 }
   0xe   :  { %p492_p6 = por %p491_p5, %p490_p4 }
  0x10   :  { %p493_p7 = pnand %p492_p6, %p486_p3 }
  0x12   :  { %496 = shalt.err (!%p493_p7)
}
  0x13   :  { %s595_s21 = smov 64   ;;  %s596_s22 = smov 4  }
  0x14   :  { %41 = dma.hbm_to_vmem [thread:$0]  %s769_s1, 128, %s36_s10, [#allocation6], %s595_s21, %s595_s21, %s596_s22  }
  0x15   :  { %s497_s27 = scalar_lea.hbm %s768_s0, 128 }
  0x16   :  { %p498_p8 = scmp.ne.s32.totalorder %s768_s0, %s497_s27  ;;  %p501_p9 = scmp.lt.u32.totalorder %s497_s27, %s768_s0 }
  0x18   :  { %p503_p10 = pnand %p501_p9, %p498_p8 }
  0x1a   :  { %506 = shalt.err (!%p503_p10)
}
  0x1b   :  { %s507_s13 = scalar_lea.vmem %s655_s12, 128  ;;  %p512_p12 = scmp.lt.s32.totalorder %s655_s12, %s655_s12 }
  0x1c   :  { %p508_p11 = scmp.ne.s32.totalorder %s655_s12, %s507_s13  ;;  %p513_p13 = scmp.lt.s32.totalorder %s507_s13, %s507_s13 }
  0x1e   :  { %p514_p0 = por %p513_p13, %p512_p12 }
  0x20   :  { %p515_p1 = pnand %p514_p0, %p508_p11 }
  0x22   :  { %518 = shalt.err (!%p515_p1)
}
  0x23   :  { %29 = dma.hbm_to_vmem [thread:$0]  %s768_s0, 128, %s655_s12, [#allocation3], %s595_s21, %s595_s21, %s596_s22  }
  0x24   :  { %s597_s14 = smov [#allocation7]   ;;  %s598_s16 = smov [#allocation8]  }
  0x25   :  { %s49_s15 = sshll.u32 %s597_s14, 4  ;;  %s67_s17 = sshll.u32 %s598_s16, 4  ;;  %s50_s15 = int_to_ptr.vmem [resolvable:$true] %s49_s15  ;;  %s692_s17 = int_to_ptr.vmem [resolvable:$true] %s67_s17 }
  0x26   :  { %s519_s20 = scalar_lea.hbm %s771_s3, 256 }
  0x27   :  { %p520_p2 = scmp.ne.s32.totalorder %s771_s3, %s519_s20  ;;  %p523_p3 = scmp.lt.u32.totalorder %s519_s20, %s771_s3 }
  0x29   :  { %p525_p4 = pnand %p523_p3, %p520_p2 }
  0x2b   :  { %528 = shalt.err (!%p525_p4)
}
  0x2c   :  { %s529_s0 = scalar_lea.vmem %s50_s15, 256  ;;  %p534_p6 = scmp.lt.s32.totalorder %s50_s15, %s50_s15 }
  0x2d   :  { %p530_p5 = scmp.ne.s32.totalorder %s50_s15, %s529_s0  ;;  %p535_p7 = scmp.lt.s32.totalorder %s529_s0, %s529_s0 }
  0x2f   :  { %p536_p8 = por %p535_p7, %p534_p6 }
  0x31   :  { %p537_p9 = pnand %p536_p8, %p530_p5 }
  0x33   :  { %540 = shalt.err (!%p537_p9)
}
  0x34   :  { %55 = dma.hbm_to_vmem [thread:$0]  %s771_s3, 256, %s50_s15, [#allocation6], %s595_s21, %s595_s21, %s596_s22  }
  0x35   :  { %s541_s30 = scalar_lea.hbm %s775_s7, 256 }
  0x36   :  { %p542_p10 = scmp.ne.s32.totalorder %s775_s7, %s541_s30  ;;  %p545_p11 = scmp.lt.u32.totalorder %s541_s30, %s775_s7 }
  0x38   :  { %p547_p12 = pnand %p545_p11, %p542_p10 }
  0x3a   :  { %550 = shalt.err (!%p547_p12)
}
  0x3b   :  { %s551_s14 = scalar_lea.vmem %s692_s17, 256  ;;  %p556_p0 = scmp.lt.s32.totalorder %s692_s17, %s692_s17 }
  0x3c   :  { %p552_p13 = scmp.ne.s32.totalorder %s692_s17, %s551_s14  ;;  %p557_p1 = scmp.lt.s32.totalorder %s551_s14, %s551_s14 }
  0x3e   :  { %p558_p2 = por %p557_p1, %p556_p0 }
  0x40   :  { %p559_p3 = pnand %p558_p2, %p552_p13 }
  0x42   :  { %562 = shalt.err (!%p559_p3)
}
  0x43   :  { %73 = dma.hbm_to_vmem [thread:$0]  %s775_s7, 256, %s692_s17, [#allocation9], %s595_s21, %s595_s21, %s596_s22  }
  0x44   :  { %585 = dma.done.wait [#allocation3], 128  }
  0x45   :  { %586 = vsyncadd [#allocation3], 4294967168 }
  0x46   :  { %587 = dma.done.wait [#allocation6], 384  }
  0x47   :  { %588 = vsyncadd [#allocation6], 4294966912 }
  0x48   :  { %589 = dma.done.wait [#allocation9], 256  }
  0x49   :  { %590 = vsyncadd [#allocation9], 4294967040  ;;  %v599_v0 = vmov 0.0   ;;  %vm600_vm0 = vmmov 0   ;;  %v467_v1 = vld [vmem:[#allocation5] sm:$0xff]   ;;  %v468_v2 = vld [vmem:[#allocation2] sm:$0xff]  }
  0x4a   :  { %425 = vmatprep.subr.bf16.mxu0 %v599_v0  ;;  %427 = vmatprep.mubr.msk.bf16.mxu0 %vm600_vm0, %v599_v0  ;;  %vm111_vm1 = vcmask 130048   ;;  %v469_v3 = vld [vmem:[#allocation7] sm:$0xff]   ;;  %v470_v4 = vld [vmem:[#allocation7 + $0x8] sm:$0xff]   ;;  %s601_s22 = smov 96   ;;  %vm182_vm2 = vcmask 261120   ;;  %v473_v31 = vld [vmem:[#allocation8] sm:$0xff]  }
  0x4b   :  { %431 = vmatprep.subr.bf16.mxu1 %v599_v0  ;;  %435 = vmatprep.mubr.msk.bf16.mxu1 %vm600_vm0, %v599_v0  ;;  %v398_v5 = vld [vmem:[%s770_s2] ss:$0 sm:$0xff]  ;;  %v472_v16 = vld [vmem:[%s773_s5 + $0x8] sm:$0xff]   ;;  %v474_v32 = vld [vmem:[#allocation8 + $0x8] sm:$0xff]   ;;  %s602_s25 = smov [#allocation10]  }
  0x4c   :  { %426 = vmatpush3.bf16.msra.mxu0 %v467_v1  ;;  %432 = vmatpush3.bf16.msra.mxu1 %v469_v3  ;;  %v471_v15 = vld [vmem:[%s773_s5] sm:$0xff]   ;;  %s384_s26 = sshll.u32 %s602_s25, 4  ;;  %s385_s26 = int_to_ptr.vmem [resolvable:$true] %s384_s26 }
  0x4d   :  { %439 = vmatprep.subr.bf16.mxu0 %v599_v0  ;;  %433 = vmatprep.subr.bf16.mxu1 %v599_v0  ;;  %v402_v18 = vld [vmem:[%s772_s4] ss:$0 sm:$0xff]  ;;  %p568_p5 = scmp.lt.s32.totalorder %s385_s26, %s385_s26 }
  0x4e   :  { %v406_v33 = vld [vmem:[%s774_s6] ss:$0 sm:$0xff]  ;;  %s563_s6 = scalar_lea.vmem %s385_s26, 256 }
  0x4f   :  { %428 = vmatmul.mubr.msk.bf16.vlgmr.msra.gmra.mrb[0].mxu0 %vm111_vm1, %v468_v2  ;;  %v410_v43 = vld [vmem:[%s776_s8] ss:$0 sm:$0xff]  ;;  %p564_p4 = scmp.ne.s32.totalorder %s385_s26, %s563_s6  ;;  %p569_p6 = scmp.lt.s32.totalorder %s563_s6, %s563_s6 }
  0x50   :  { %443 = vmatprep.mubr.msk.bf16.mxu0 %vm600_vm0, %v599_v0  ;;  %434 = vmatpush3.bf16.msra.mxu1 %v470_v4 }
  0x51   :  { %447 = vmatprep.subr.bf16.mxu1 %v599_v0  ;;  %440 = vmatpush3.bf16.msra.mxu0 %v471_v15  ;;  %p570_p7 = por %p569_p6, %p568_p5 }
  0x52   :  { %441 = vmatprep.subr.bf16.mxu0 %v599_v0 }
  0x53   :  { %p571_p8 = pnand %p570_p7, %p564_p4 }
  0x55   :  { %442 = vmatpush3.bf16.msra.mxu0 %v472_v16 }
 0x122   :  { %v149_v6 = vpop.f32.mrb[0].mxu0 }
 0x123   :  { %v150_v7 = vadd.f32 %v398_v5, %v149_v6  ;;  %v429_v8 = vpop.f32.mrb[1].mxu0 }
 0x124   :  { %v152_v9 = vpop.f32.mrb[2].mxu0 }
 0x125   :  { %v153_v10 = vadd.f32 %v398_v5, %v152_v9  ;;  %229 = vrot.lane.b32.xlu0 %v150_v7, %s601_s22  ;;  %v430_v11 = vpop.f32.mrb[3].mxu0  ;;  %v156_v12 = vmax.f32 %v150_v7, 0.0 }
 0x127   :  { %v157_v13 = vmax.f32 %v153_v10, 0.0 }
 0x129   :  { %v158_v14 = vpack.c.bf16 %v157_v13, %v156_v12  ;;  %231 = vrot.lane.b32.xlu0 %v153_v10, %s601_s22 }
 0x12b   :  { %436 = vmatmul.mubr.msk.bf16.vlgmr.msra.gmra.mrb[0].mxu1 %vm182_vm2, %v158_v14 }
 0x12c   :  { %451 = vmatprep.mubr.msk.bf16.mxu1 %vm600_vm0, %v599_v0  ;;  %448 = vmatpush3.bf16.msra.mxu1 %v473_v31 }
 0x12d   :  { %449 = vmatprep.subr.bf16.mxu1 %v599_v0 }
 0x130   :  { %450 = vmatpush3.bf16.msra.mxu1 %v474_v32 }
 0x197   :  { %v230_v17 = vpop.permute.xlu0 %229 }
 0x19b   :  { %v232_v26 = vpop.permute.xlu0 %231 }
 0x1fe   :  { %v220_v19 = vpop.f32.mrb[0].mxu1 }
 0x1ff   :  { %v221_v20 = vadd.f32 %v402_v18, %v220_v19  ;;  %v437_v21 = vpop.f32.mrb[1].mxu1 }
 0x200   :  { %v223_v22 = vpop.f32.mrb[2].mxu1 }
 0x201   :  { %v235_v23 = vadd.f32 %v230_v17, %v221_v20  ;;  %v224_v24 = vadd.f32 %v402_v18, %v223_v22  ;;  %v438_v25 = vpop.f32.mrb[3].mxu1 }
 0x203   :  { %v236_v27 = vadd.f32 %v232_v26, %v224_v24  ;;  %v237_v28 = vmax.f32 %v235_v23, 0.0 }
 0x205   :  { %v238_v29 = vmax.f32 %v236_v27, 0.0 }
 0x207   :  { %v239_v30 = vpack.c.bf16 %v238_v29, %v237_v28 }
 0x209   :  { %444 = vmatmul.mubr.msk.bf16.vlgmr.msra.gmra.mrb[4].mxu0 %vm182_vm2, %v239_v30 }
 0x2dc   :  { %v300_v34 = vpop.f32.mrb[4].mxu0 }
 0x2dd   :  { %v301_v35 = vadd.f32 %v406_v33, %v300_v34  ;;  %v445_v36 = vpop.f32.mrb[5].mxu0 }
 0x2de   :  { %v303_v37 = vpop.f32.mrb[6].mxu0 }
 0x2df   :  { %v304_v38 = vadd.f32 %v406_v33, %v303_v37  ;;  %v446_v39 = vpop.f32.mrb[7].mxu0  ;;  %v307_v40 = vmax.f32 %v301_v35, 0.0 }
 0x2e1   :  { %v308_v41 = vmax.f32 %v304_v38, 0.0 }
 0x2e3   :  { %v309_v42 = vpack.c.bf16 %v308_v41, %v307_v40 }
 0x2e5   :  { %452 = vmatmul.mubr.msk.bf16.vlgmr.msra.gmra.mrb[4].mxu1 %vm182_vm2, %v309_v42 }
 0x3b8   :  { %v370_v44 = vpop.f32.mrb[4].mxu1 }
 0x3b9   :  { %v371_v45 = vadd.f32 %v410_v43, %v370_v44  ;;  %v453_v46 = vpop.f32.mrb[5].mxu1 }
 0x3ba   :  { %v373_v47 = vpop.f32.mrb[6].mxu1 }
 0x3bb   :  { %377 = vst.msk [vmem:[#allocation10] sm:$0xff] %vm182_vm2, %v371_v45  ;;  %v374_v48 = vadd.f32 %v410_v43, %v373_v47  ;;  %v454_v49 = vpop.f32.mrb[7].mxu1 }
 0x3bd   :  { %378 = vst.msk [vmem:[#allocation10 + $0x8] sm:$0xff] %vm182_vm2, %v374_v48 }
 0x3be   :  { %574 = shalt.err (!%p571_p8)
}
 0x3bf   :  { %s575_s12 = scalar_lea.hbm %s777_s9, 256 }
 0x3c0   :  { %p576_p9 = scmp.ne.s32.totalorder %s777_s9, %s575_s12  ;;  %p579_p10 = scmp.lt.u32.totalorder %s575_s12, %s777_s9 }
 0x3c2   :  { %p581_p11 = pnand %p579_p10, %p576_p9 }
 0x3c4   :  { %584 = shalt.err (!%p581_p11)
}
 0x3c5   :  { %s603_s11 = smov 128   ;;  %s604_s13 = smov 8  }
 0x3c6   :  { %390 = dma.vmem_to_hbm [thread:$0]  %s385_s26, 256, %s777_s9, [#allocation4], %s603_s11, %s603_s11, %s604_s13  }
 0x3c7   :  { %591 = dma.done.wait [#allocation4], 256  }
 0x3c8   :  { %592 = vsyncadd [#allocation4], 4294967040 }
 0x3c9   :  { %394 = vsyncpa [#allocation3], 1 }
 0x3ca   :  { %395 = vsyncpa [#allocation6], 1 }
 0x3cb   :  { %396 = vsyncpa [#allocation9], 1 }
 0x3cc   :  { %397 = vsyncpa [#allocation4], 1 }

</bundles_post_ra>
